<compile_context>
chip_gen: v5e
topology: v5e:2x2
jax: 0.10.0
libtpu: 0.0.40
codegen_flags: <defaults>
</compile_context>

<pallas_src>
import jax
import jax.numpy as jnp
import numpy as np
from jax.experimental import pallas as pl
from jax.experimental.pallas import tpu as pltpu

_LANE = 128
_TARGET_BLOCK_ROWS = 4096       # (4096,128) f32 operand = 2 MiB/block; double-buffered
                                # working set (i8 cond + x + y + out) ~= 13.5 MiB.
_SINGLE_BLOCK_MAX_ROWS = 256    # below this, one full-array block (overhead dominated)
_ROW_ALIGN = 32                 # sublane multiple legal for int8 / bf16 / f32 tiles
_VMEM_LIMIT_BYTES = 48 * 1024 * 1024   # > v5e's 16 MiB default, < v7x's 64 MiB physical


def _make_where_kernel(is_scalar):
    cond_scalar, x_scalar, y_scalar = is_scalar

    def kernel(cond_ref, x_ref, y_ref, o_ref):
        c = cond_ref[0] if cond_scalar else cond_ref[...]
        x = x_ref[0] if x_scalar else x_ref[...]
        y = y_ref[0] if y_scalar else y_ref[...]
        # In-kernel upcast: operands arrive at native width; the cast is free on
        # the VPU while halving DMA traffic for narrow dtypes.
        res = jnp.where(c != 0, x.astype(o_ref.dtype), y.astype(o_ref.dtype))
        o_ref[...] = jnp.broadcast_to(res, o_ref.shape)

    return kernel


def pallas_where(cond, x, y):
    """Semantics of torch.where(cond, x, y) with broadcasting."""
    cond = jnp.asarray(cond)
    x = jnp.asarray(x)
    y = jnp.asarray(y)

    out_shape = jnp.broadcast_shapes(cond.shape, x.shape, y.shape)
    out_dtype = jnp.result_type(x.dtype, y.dtype)
    n = int(np.prod(out_shape, dtype=np.int64))

    if n == 0:                                   # empty output: nothing to launch
        return jnp.zeros(out_shape, out_dtype)

    rows = -(-n // _LANE)                        # ceil(n / 128)
    n_pad = rows * _LANE

    # Scalar (size-1) x / y go through SMEM -> zero HBM traffic instead of a
    # full broadcast_to copy.  Scalar cond keeps the VMEM path (only 1 B/elem
    # and avoids relying on a scalar->mask splat lowering).
    x_scalar = (x.size == 1) and n > 1
    y_scalar = (y.size == 1) and n > 1
    is_scalar = (False, x_scalar, y_scalar)

    def prep_vmem(a):
        # Only materialise a broadcast when the operand does not already cover
        # the full output shape; full-shape operands are just reshaped (free).
        if tuple(a.shape) != tuple(out_shape):
            a = jnp.broadcast_to(a, out_shape)
        flat = a.reshape(-1)
        if n_pad != n:                            # pad only when n % 128 != 0
            flat = jnp.pad(flat, (0, n_pad - n))
        return flat.reshape(rows, _LANE)

    def prep_smem(a):
        sdt = jnp.float32 if jnp.issubdtype(out_dtype, jnp.floating) else jnp.int32
        return a.astype(sdt).reshape(1)

    cond_in = prep_vmem((cond != 0).astype(jnp.int8))   # bool->i8 on the small array
    x_in = prep_smem(x) if x_scalar else prep_vmem(x)   # native dtype, cast in kernel
    y_in = prep_smem(y) if y_scalar else prep_vmem(y)

    # ---- block / grid selection ----
    if rows <= _SINGLE_BLOCK_MAX_ROWS:
        block_rows = rows        # block == full array dims -> (8,128) rule trivially met
    else:
        # >= 2 near-equal blocks close to the target: both v7x TensorCores get
        # work, and large inputs amortise the per-step overhead.
        num_blocks = max(2, -(-rows // _TARGET_BLOCK_ROWS))
        block_rows = -(-rows // num_blocks)
        block_rows = -(-block_rows // _ROW_ALIGN) * _ROW_ALIGN
    grid = (pl.cdiv(rows, block_rows),)          # Pallas masks the partial edge block

    slab_spec = pl.BlockSpec((block_rows, _LANE), lambda i: (i, 0))
    smem_spec = pl.BlockSpec(memory_space=pltpu.MemorySpace.SMEM)
    in_specs = [smem_spec if s else slab_spec for s in is_scalar]

    bytes_accessed = sum(int(a.size) * a.dtype.itemsize for a in (cond_in, x_in, y_in))
    bytes_accessed += n_pad * jnp.dtype(out_dtype).itemsize

    out_slab = pl.pallas_call(
        _make_where_kernel(is_scalar),
        out_shape=jax.ShapeDtypeStruct((rows, _LANE), out_dtype),
        grid_spec=pltpu.PrefetchScalarGridSpec(
            num_scalar_prefetch=0,
            grid=grid,
            in_specs=in_specs,
            out_specs=slab_spec,
        ),
        compiler_params=pltpu.CompilerParams(
            dimension_semantics=("parallel",),
            vmem_limit_bytes=_VMEM_LIMIT_BYTES,
            allow_input_fusion=[not s for s in is_scalar],
        ),
        cost_estimate=pl.CostEstimate(
            flops=n, transcendentals=0, bytes_accessed=int(bytes_accessed)
        ),
    )(cond_in, x_in, y_in)

    out_flat = out_slab.reshape(-1)
    if n_pad != n:
        out_flat = out_flat[:n]
    return out_flat.reshape(out_shape)


if __name__ == "__main__":
    key = jax.random.PRNGKey(0)
    k1, k2, k3, k4, k5 = jax.random.split(key, 5)

    # Primary test (matches the torch module): broadcasting where.
    #   cond: (2, 4, 1, 16)  bool
    #   x:    (2, 4, 16, 16) float32
    #   y:    (1, 4, 16, 16) float32
    cond = jax.random.bernoulli(k1, 0.5, (2, 4, 1, 16))
    x = jax.random.normal(k2, (2, 4, 16, 16), dtype=jnp.float32)
    y = jax.random.normal(k3, (1, 4, 16, 16), dtype=jnp.float32)
    out = jax.block_until_ready(pallas_where(cond, x, y))
    ref = jnp.where(cond, x, y)
    np.testing.assert_array_equal(np.asarray(out), np.asarray(ref))

    # Secondary test: multi-block grid with a partial edge block, a scalar
    # operand (SMEM path) and an in-kernel bf16 -> f32 upcast.
    cond2 = jax.random.bernoulli(k4, 0.3, (517, 130))
    x2 = jax.random.normal(k5, (517, 130), dtype=jnp.bfloat16)
    y2 = jnp.float32(-1.5)
    out2 = jax.block_until_ready(pallas_where(cond2, x2, y2))
    ref2 = jnp.where(cond2, x2.astype(jnp.float32), jnp.asarray(-1.5, jnp.float32))
    np.testing.assert_array_equal(np.asarray(out2), np.asarray(ref2))

    print("KERNEL_OK")
</pallas_src>

<mosaic_0001>
module attributes {stable_mosaic.version = 11 : i64} {
  func.func @kernel(%arg0: i32, %arg1: memref<16x128xi8, #tpu.memory_space<vmem>>, %arg2: memref<16x128xf32, #tpu.memory_space<vmem>>, %arg3: memref<16x128xf32, #tpu.memory_space<vmem>>, %arg4: memref<16x128xf32, #tpu.memory_space<vmem>>) attributes {dimension_semantics = [#tpu.dimension_semantics<parallel>], iteration_bounds = array<i64: 1>, scalar_prefetch = 0 : i64, scratch_operands = 0 : i64, tpu.core_type = #tpu.core_type<tc>, window_params = [{transform_indices = @transform_0, window_bounds = array<i64: 16, 128>}, {transform_indices = @transform_1, window_bounds = array<i64: 16, 128>}, {transform_indices = @transform_2, window_bounds = array<i64: 16, 128>}, {transform_indices = @transform_3, window_bounds = array<i64: 16, 128>}]} {
    %c0 = arith.constant 0 : index
    %c0_0 = arith.constant 0 : index
    %0 = vector.load %arg1[%c0, %c0_0] : memref<16x128xi8, #tpu.memory_space<vmem>>, vector<16x128xi8>
    %c0_1 = arith.constant 0 : index
    %c0_2 = arith.constant 0 : index
    %1 = vector.load %arg2[%c0_1, %c0_2] : memref<16x128xf32, #tpu.memory_space<vmem>>, vector<16x128xf32>
    %c0_3 = arith.constant 0 : index
    %c0_4 = arith.constant 0 : index
    %2 = vector.load %arg3[%c0_3, %c0_4] : memref<16x128xf32, #tpu.memory_space<vmem>>, vector<16x128xf32>
    %c0_i8 = arith.constant 0 : i8
    %3 = vector.broadcast %c0_i8 : i8 to vector<16x128xi8>
    %4 = arith.cmpi ne, %0, %3 : vector<16x128xi8>
    %5 = arith.select %4, %1, %2 : vector<16x128xi1>, vector<16x128xf32>
    %c0_5 = arith.constant 0 : index
    %c0_6 = arith.constant 0 : index
    %6 = vector.load %arg4[%c0_5, %c0_6] : memref<16x128xf32, #tpu.memory_space<vmem>>, vector<16x128xf32>
    tpu.vector_store %arg4[%c0_5, %c0_6], %5 {strides = array<i32>} : memref<16x128xf32, #tpu.memory_space<vmem>>, vector<16x128xf32>,
    return
  }
  func.func @transform_0(%arg0: i32) -> (i32, i32) {
    %c0_i32 = arith.constant 0 : i32
    %c0_i32_0 = arith.constant 0 : i32
    return %arg0, %c0_i32 : i32, i32
  }
  func.func @transform_1(%arg0: i32) -> (i32, i32) {
    %c0_i32 = arith.constant 0 : i32
    %c0_i32_0 = arith.constant 0 : i32
    return %arg0, %c0_i32 : i32, i32
  }
  func.func @transform_2(%arg0: i32) -> (i32, i32) {
    %c0_i32 = arith.constant 0 : i32
    %c0_i32_0 = arith.constant 0 : i32
    return %arg0, %c0_i32 : i32, i32
  }
  func.func @transform_3(%arg0: i32) -> (i32, i32) {
    %c0_i32 = arith.constant 0 : i32
    %c0_i32_0 = arith.constant 0 : i32
    return %arg0, %c0_i32 : i32, i32
  }
}

</mosaic_0001>

<bundles_post_ra>
// kernel: tpu_custom_call.1
= control target key start
LH: loop header
LB: loop body
LE: loop exit
PB: predicated region body
PF: predicated region fallthrough
CT: control target
= control target key end

     0   :  { %8 = vsyncpa [#allocation3], 0  ;;  %s263_s0 = inlined_call_operand.hbm [shape: s8[16,128], index: 0, kind: input, shape index: {}]   ;;  %s264_s1 = inlined_call_operand.hbm [shape: f32[16,128], index: 1, kind: input, shape index: {}]   ;;  %s265_s2 = inlined_call_operand.hbm [shape: f32[16,128], index: 2, kind: input, shape index: {}]   ;;  %s266_s3 = inlined_call_operand.hbm [shape: f32[16,128], index: 3, kind: output, shape index: {}]  }
   0x1   :  { %9 = vsyncpa [#allocation6], 0  ;;  %s28_s14 = sshll.u32 %s264_s1, 4  ;;  %s29_s14 = int_to_ptr.hbm [resolvable:$true] %s28_s14 }
   0x2   :  { %10 = vsyncpa [#allocation4], 0  ;;  %s213_s15 = smov [#allocation5]   ;;  %s15_s19 = sshll.u32 %s263_s0, 4  ;;  %s16_s19 = int_to_ptr.hbm [resolvable:$true] %s15_s19 }
   0x3   :  { %s30_s16 = sshll.u32 %s213_s15, 4  ;;  %s214_s20 = smov 128   ;;  %s31_s16 = int_to_ptr.vmem [resolvable:$true] %s30_s16 }
   0x4   :  { %s215_s21 = smov 8   ;;  %s216_s22 = smov [#allocation2]  }
   0x5   :  { %36 = dma.hbm_to_vmem [thread:$0]  %s29_s14, 256, %s31_s16, [#allocation6], %s214_s20, %s214_s20, %s215_s21  }
   0x6   :  { %s17_s23 = sshll.u32 %s216_s22, 4  ;;  %s217_s1 = smov 32   ;;  %s18_s23 = int_to_ptr.vmem [resolvable:$true] %s17_s23 }
   0x7   :  { %s218_s24 = smov 2   ;;  %s41_s27 = sshll.u32 %s265_s2, 4  ;;  %s42_s27 = int_to_ptr.hbm [resolvable:$true] %s41_s27 }
   0x8   :  { %23 = dma.hbm_to_vmem [thread:$0]  %s16_s19, 64, %s18_s23, [#allocation3], %s217_s1, %s217_s1, %s218_s24  }
   0x9   :  { %s219_s28 = smov [#allocation7]  }
   0xa   :  { %s43_s0 = sshll.u32 %s219_s28, 4  ;;  %s44_s0 = int_to_ptr.vmem [resolvable:$true] %s43_s0 }
   0xb   :  { %49 = dma.hbm_to_vmem [thread:$0]  %s42_s27, 256, %s44_s0, [#allocation6], %s214_s20, %s214_s20, %s215_s21  }
   0xc   :  { %207 = dma.done.wait [#allocation3], 64  }
   0xd   :  { %208 = vsyncadd [#allocation3], 4294967232 }
   0xe   :  { %209 = dma.done.wait [#allocation6], 512  }
   0xf   :  { %210 = vsyncadd [#allocation6], 4294966784  ;;  %v64_v0 = vld [vmem:[#allocation2] sm:$0x3]  ;;  %v65_v1 = vld [vmem:[#allocation2 + $0x2] sm:$0x3] }
  0x10   :  { %vm70_vm0 = vnez %v64_v0  ;;  %v220_v2 = vmov 0   ;;  %vm71_vm1 = vnez %v65_v1  ;;  %v66_v4 = vld [vmem:[#allocation5] sm:$0xff]  ;;  %v68_v5 = vld [vmem:[#allocation7] sm:$0xff]  ;;  %s221_s2 = smov [#allocation8]   ;;  %s88_s5 = sshll.u32 %s266_s3, 4  ;;  %v67_v8 = vld [vmem:[#allocation5 + $0x8] sm:$0xff]  ;;  %s89_s5 = int_to_ptr.hbm [resolvable:$true] %s88_s5 }
  0x11   :  { %v72_v3 = vsel %vm70_vm0, 16843009, %v220_v2  ;;  %v73_v7 = vsel %vm71_vm1, 16843009, %v220_v2  ;;  %s86_s29 = sshll.u32 %s221_s2, 4  ;;  %v69_v9 = vld [vmem:[#allocation7 + $0x8] sm:$0xff]  ;;  %s87_s29 = int_to_ptr.vmem [resolvable:$true] %s86_s29 }
  0x12   :  { %v74_v6 = vunpack.c.0.s8 %v72_v3  ;;  %v75_v10 = vunpack.c.0.s8 %v73_v7 }
  0x14   :  { %vm76_vm2 = vcmp.ne.s32.totalorder %v74_v6, 0  ;;  %vm77_vm3 = vcmp.ne.s32.totalorder %v75_v10, 0 }
  0x15   :  { %v78_v11 = vsel %vm76_vm2, %v66_v4, %v68_v5  ;;  %v79_v12 = vsel %vm77_vm3, %v67_v8, %v69_v9 }
  0x16   :  { %80 = vst [vmem:[#allocation8] sm:$0xff] %v78_v11 }
  0x17   :  { %81 = vst [vmem:[#allocation8 + $0x8] sm:$0xff] %v79_v12 }
  0x18   :  { %94 = dma.vmem_to_hbm [thread:$0]  %s87_s29, 256, %s89_s5, [#allocation4], %s214_s20, %s214_s20, %s215_s21  }
  0x19   :  { %211 = dma.done.wait [#allocation4], 256  }
  0x1a   :  { %212 = vsyncadd [#allocation4], 4294967040 }
  0x1b   :  { %99 = vsyncpa [#allocation3], 1 }
  0x1c   :  { %100 = vsyncpa [#allocation6], 1 }
  0x1d   :  { %101 = vsyncpa [#allocation4], 1 }

</bundles_post_ra>
